<compile_context>
chip_gen: v7x
topology: tpu7x:2x2x1
jax: 0.10.0
libtpu: 0.0.40
codegen_flags: <defaults>
</compile_context>

<pallas_src>
import math

import jax
import jax.numpy as jnp
from jax import lax
from jax.experimental import pallas as pl
from jax.experimental.pallas import tpu as pltpu

_INV_SQRT2 = 1.0 / math.sqrt(2.0)
_PACK = 4  # logical D-rows packed per 128-lane row (4 * 32 = 128 lanes)


def _gelu_exact(x):
    # torch.nn.GELU() default is the exact (erf-based) GELU.
    return 0.5 * x * (1.0 + lax.erf(x * _INV_SQRT2))


def _round_up(n, m):
    return ((n + m - 1) // m) * m


def emb2expr_kernel(x_ref, w_ref, b_ref, wf_ref, o_ref):
    # x_ref : (tp, P*D)    P logical rows lane-packed per row (f32 or bf16)
    # w_ref : (P*D, P*D)   block-diagonal [P copies of W0.T], bf16
    # b_ref : (1, P*D)     b0 tiled P times, f32
    # wf_ref: (P, P*D)     final Linear weight, block layout, bf16
    # o_ref : (P, tp)      o[j, r] = output of logical row P*r + j
    x_bf = x_ref[...].astype(jnp.bfloat16)          # bf16 MXU operands, single-pass
    h = jnp.dot(x_bf, w_ref[...], preferred_element_type=jnp.float32) + b_ref[...]
    h = _gelu_exact(h)                              # exact erf-GELU in f32 (torch default; v5e-safe)
    # (P, P*D) x (tp, P*D) contracting on lanes -> (P, tp): born lane-dense,
    # no (tp, 1) column intermediate and no masked narrow-lane stores.
    y = lax.dot_general(
        wf_ref[...], h.astype(jnp.bfloat16),
        dimension_numbers=(((1,), (1,)), ((), ())),
        preferred_element_type=jnp.float32,
    )
    o_ref[...] = y


def embedding_to_expression(x, w0_t, b0, wf, *, tp_max=4096):
    """x: [..., D] -> [...]  (module: [cells, regions, D] -> [cells, regions]).

    w0_t  : (D, D)  = W0.T (torch Linear(D, D).weight transposed)
    b0    : (D,)    first Linear bias
    wf    : (1, D)  torch Linear(D, 1, bias=False).weight (torch layout)
    tp_max: max packed-row tile (multiple of 128). tp=4096 packed rows = 16384
            logical rows = 2 MiB f32 per input block; fits all chips' VMEM with
            double-buffering + f32 GELU temporaries.
    x is read in whatever dtype it already has (no wrapper-side cast); pass a
    bf16 x to halve input HBM traffic.
    """
    lead = x.shape[:-1]
    D = x.shape[-1]
    N = 1
    for s in lead:
        N *= s
    P = _PACK
    W = P * D  # packed lane width (128 for D=32)

    x2 = x.reshape(N, D)
    pad4 = (-N) % P
    if pad4:
        # Rare case (N not a multiple of 4): pad a few rows so the 128-lane
        # packed view exists. This is the only path that materializes a copy.
        x2 = jnp.pad(x2, ((0, pad4), (0, 0)))
    Np = (N + pad4) // P
    xp = x2.reshape(Np, W)  # contiguous merge -> bitcast, no HBM copy

    # Packed parameters (tiny; built once, bf16 for single-pass MXU).
    eye = jnp.eye(P, dtype=jnp.float32)
    w_bd = jnp.kron(eye, w0_t.astype(jnp.float32)).astype(jnp.bfloat16)             # (W, W)
    b_t = jnp.tile(b0.astype(jnp.float32), P).reshape(1, W)                          # (1, W)
    wf_p = jnp.kron(eye, wf.reshape(1, D).astype(jnp.float32)).astype(jnp.bfloat16)  # (P, W)

    # Tile: multiple of 128 (lane-dense output blocks), large enough to amortize
    # the ~0.35us per-step overhead, small enough to keep >=2 grid steps so the
    # "parallel" axis can shard across v7x's two TensorCores.
    tp = max(128, min(_round_up(tp_max, 128), _round_up(pl.cdiv(Np, 2), 128)))
    if tp >= Np:
        tp = Np  # single full-extent block (always a legal block shape)
    grid = pl.cdiv(Np, tp)  # ragged tail handled by Pallas block masking (no jnp.pad)

    x_bytes = x2.dtype.itemsize
    cost = pl.CostEstimate(
        flops=N * (2 * D * D + 2 * D),
        transcendentals=N * D,  # erf in GELU
        bytes_accessed=N * D * x_bytes + (W * W + P * W) * 2 + W * 4 + N * 4,
    )

    out = pl.pallas_call(
        emb2expr_kernel,
        out_shape=jax.ShapeDtypeStruct((P, Np), jnp.float32),
        grid=(grid,),
        in_specs=[
            pl.BlockSpec((tp, W), lambda i: (i, 0)),  # packed embedding rows
            pl.BlockSpec((W, W), lambda i: (0, 0)),   # block-diag W0.T (resident)
            pl.BlockSpec((1, W), lambda i: (0, 0)),   # tiled bias
            pl.BlockSpec((P, W), lambda i: (0, 0)),   # packed final weight
        ],
        out_specs=pl.BlockSpec((P, tp), lambda i: (0, i)),
        compiler_params=pltpu.CompilerParams(
            dimension_semantics=("parallel",),
            vmem_limit_bytes=32 * 1024 * 1024,
        ),
        cost_estimate=cost,
    )(xp, w_bd, b_t, wf_p)

    # out[j, r] corresponds to logical row P*r + j: un-interleave on the tiny
    # (P, Np) output, drop padded tail, restore leading shape.
    y = out.T.reshape(P * Np)[:N]
    return y.reshape(lead)


def _reference(x, w0_t, b0, wf):
    """Pure-JAX f32 reference (high-precision matmuls)."""
    D = x.shape[-1]
    x2 = x.reshape(-1, D).astype(jnp.float32)
    h = _gelu_exact(jnp.dot(x2, w0_t, precision=lax.Precision.HIGHEST) + b0[None, :])
    y = jnp.dot(h, wf.reshape(D, 1), precision=lax.Precision.HIGHEST)
    return y.reshape(x.shape[:-1])


if __name__ == "__main__":
    # Module-consistent small shapes: n_input_embedding_dimensions = 32.
    cells, regions, D = 24, 100, 32

    key = jax.random.PRNGKey(0)
    kx, kw0, kb0, kwf = jax.random.split(key, 4)

    x = jax.random.normal(kx, (cells, regions, D), dtype=jnp.float32)

    # Linear(D, D): torch stores weight [out, in]; we keep it pre-transposed (W0.T).
    bound0 = 1.0 / math.sqrt(D)
    w0_t = jax.random.uniform(kw0, (D, D), jnp.float32, -bound0, bound0)   # = W0.T
    b0 = jax.random.uniform(kb0, (D,), jnp.float32, -bound0, bound0)
    # Linear(D, 1, bias=False): module zeroes it at init; random here (see note above).
    wf = jax.random.uniform(kwf, (1, D), jnp.float32, -bound0, bound0)     # torch layout [1, D]

    # Main path: N = 2400 -> Np = 600 packed rows, 2 grid steps, ragged tail block.
    y = jax.block_until_ready(embedding_to_expression(x, w0_t, b0, wf))
    ref = _reference(x, w0_t, b0, wf)
    assert y.shape == (cells, regions)
    # bf16 MXU inputs (f32 accumulation) -> slightly looser tolerance vs f32 reference.
    assert jnp.allclose(y, ref, atol=2e-2, rtol=2e-2), "mismatch vs reference"

    # Odd-size path: N % 4 != 0 (4-row packing pad) and a single full-extent block.
    x_odd = jax.random.normal(kx, (7, 13, D), dtype=jnp.float32)
    y_odd = jax.block_until_ready(embedding_to_expression(x_odd, w0_t, b0, wf))
    ref_odd = _reference(x_odd, w0_t, b0, wf)
    assert y_odd.shape == (7, 13)
    assert jnp.allclose(y_odd, ref_odd, atol=2e-2, rtol=2e-2), "odd-size mismatch"

    print("KERNEL_OK")
</pallas_src>

<mosaic_0001>
module attributes {stable_mosaic.version = 11 : i64} {
  func.func @emb2expr_kernel(%arg0: i32, %arg1: memref<384x128xf32, #tpu.memory_space<vmem>>, %arg2: memref<128x128xbf16, #tpu.memory_space<vmem>>, %arg3: memref<1x128xf32, #tpu.memory_space<vmem>>, %arg4: memref<4x128xbf16, #tpu.memory_space<vmem>>, %arg5: memref<4x384xf32, #tpu.memory_space<vmem>>) attributes {dimension_semantics = [#tpu.dimension_semantics<parallel>], iteration_bounds = array<i64: 2>, scalar_prefetch = 0 : i64, scratch_operands = 0 : i64, tpu.core_type = #tpu.core_type<tc>, window_params = [{transform_indices = @transform_0, window_bounds = array<i64: 384, 128>}, {pipeline_mode = #tpu.pipeline_mode<synchronous>, transform_indices = @transform_1, window_bounds = array<i64: 128, 128>}, {pipeline_mode = #tpu.pipeline_mode<synchronous>, transform_indices = @transform_2, window_bounds = array<i64: 1, 128>}, {pipeline_mode = #tpu.pipeline_mode<synchronous>, transform_indices = @transform_3, window_bounds = array<i64: 4, 128>}, {transform_indices = @transform_4, window_bounds = array<i64: 4, 384>}]} {
    %c0 = arith.constant 0 : index
    %c0_0 = arith.constant 0 : index
    %0 = vector.load %arg1[%c0, %c0_0] : memref<384x128xf32, #tpu.memory_space<vmem>>, vector<384x128xf32>
    %1 = arith.truncf %0 : vector<384x128xf32> to vector<384x128xbf16>
    %c0_1 = arith.constant 0 : index
    %c0_2 = arith.constant 0 : index
    %2 = vector.load %arg2[%c0_1, %c0_2] : memref<128x128xbf16, #tpu.memory_space<vmem>>, vector<128x128xbf16>
    %cst = arith.constant dense<0.000000e+00> : vector<384x128xf32>
    %3 = tpu.matmul %1, %2, %cst {dimension_numbers = #tpu.dot_dimension_numbers<[1], [0], [0], [1], [0, 0, 1, 1], [], []>} : vector<384x128xbf16>, vector<128x128xbf16>, vector<384x128xf32> -> vector<384x128xf32>
    %c0_3 = arith.constant 0 : index
    %c0_4 = arith.constant 0 : index
    %4 = vector.load %arg3[%c0_3, %c0_4] : memref<1x128xf32, #tpu.memory_space<vmem>>, vector<1x128xf32>
    %5 = vector.broadcast %4 : vector<1x128xf32> to vector<384x128xf32>
    %6 = arith.addf %3, %5 : vector<384x128xf32>
    %cst_5 = arith.constant 5.000000e-01 : f32
    %7 = vector.broadcast %cst_5 : f32 to vector<384x128xf32>
    %8 = arith.mulf %7, %6 : vector<384x128xf32>
    %cst_6 = arith.constant 0.707106769 : f32
    %9 = vector.broadcast %cst_6 : f32 to vector<384x128xf32>
    %10 = arith.mulf %6, %9 : vector<384x128xf32>
    %11 = math.erf %10 : vector<384x128xf32>
    %cst_7 = arith.constant 1.000000e+00 : f32
    %12 = vector.broadcast %cst_7 : f32 to vector<384x128xf32>
    %13 = arith.addf %12, %11 : vector<384x128xf32>
    %14 = arith.mulf %8, %13 : vector<384x128xf32>
    %c0_8 = arith.constant 0 : index
    %c0_9 = arith.constant 0 : index
    %15 = vector.load %arg4[%c0_8, %c0_9] : memref<4x128xbf16, #tpu.memory_space<vmem>>, vector<4x128xbf16>
    %16 = arith.truncf %14 : vector<384x128xf32> to vector<384x128xbf16>
    %cst_10 = arith.constant dense<0.000000e+00> : vector<4x384xf32>
    %17 = tpu.matmul %15, %16, %cst_10 {dimension_numbers = #tpu.dot_dimension_numbers<[1], [1], [0], [0], [0, 0, 1, 0], [], []>} : vector<4x128xbf16>, vector<384x128xbf16>, vector<4x384xf32> -> vector<4x384xf32>
    %c0_11 = arith.constant 0 : index
    %c0_12 = arith.constant 0 : index
    %18 = vector.load %arg5[%c0_11, %c0_12] : memref<4x384xf32, #tpu.memory_space<vmem>>, vector<4x384xf32>
    tpu.vector_store %arg5[%c0_11, %c0_12], %17 {strides = array<i32>} : memref<4x384xf32, #tpu.memory_space<vmem>>, vector<4x384xf32>,
    return
  }
  func.func @transform_0(%arg0: i32) -> (i32, i32) {
    %c0_i32 = arith.constant 0 : i32
    %c0_i32_0 = arith.constant 0 : i32
    return %arg0, %c0_i32 : i32, i32
  }
  func.func @transform_1(%arg0: i32) -> (i32, i32) {
    %c0_i32 = arith.constant 0 : i32
    %c0_i32_0 = arith.constant 0 : i32
    %c0_i32_1 = arith.constant 0 : i32
    return %c0_i32, %c0_i32_0 : i32, i32
  }
  func.func @transform_2(%arg0: i32) -> (i32, i32) {
    %c0_i32 = arith.constant 0 : i32
    %c0_i32_0 = arith.constant 0 : i32
    %c0_i32_1 = arith.constant 0 : i32
    return %c0_i32, %c0_i32_0 : i32, i32
  }
  func.func @transform_3(%arg0: i32) -> (i32, i32) {
    %c0_i32 = arith.constant 0 : i32
    %c0_i32_0 = arith.constant 0 : i32
    %c0_i32_1 = arith.constant 0 : i32
    return %c0_i32, %c0_i32_0 : i32, i32
  }
  func.func @transform_4(%arg0: i32) -> (i32, i32) {
    %c0_i32 = arith.constant 0 : i32
    %c0_i32_0 = arith.constant 0 : i32
    return %c0_i32, %arg0 : i32, i32
  }
}

</mosaic_0001>

<bundles_post_ra>
// kernel: tpu_custom_call.1
= control target key start
LH: loop header
LB: loop body
LE: loop exit
PB: predicated region body
PF: predicated region fallthrough
CT: control target
= control target key end

     0   :  { %9 = vsyncpa [#allocation3], 0  ;;  %s2133_s0 = inlined_call_operand.hbm [shape: f32[600,128], index: 0, kind: input, shape index: {}]   ;;  %s2134_s1 = inlined_call_operand.hbm [shape: bf16[128,128], index: 1, kind: input, shape index: {}]   ;;  %s2135_s2 = inlined_call_operand.vmem [shape: f32[1,128], index: 2, kind: input, shape index: {}]   ;;  %s2136_s3 = inlined_call_operand.vmem [shape: bf16[4,128], index: 3, kind: input, shape index: {}]   ;;  %s2137_s4 = inlined_call_operand.hbm [shape: f32[4,600], index: 4, kind: output, shape index: {}]  }
   0x1   :  { %11 = vsyncpa [#allocation3 + $0x1], 0 }
   0x2   :  { %12 = vsyncpa [#allocation6], 0 }
   0x3   :  { %13 = vsyncpa [#allocation4], 0 }
   0x4   :  { %15 = vsyncpa [#allocation4 + $0x1], 0  ;;  %s1582_s15 = smov 0   ;;  %s1584_s16 = smov 0  }
   0x5   :  { %s1586_s17 = smov 0   ;;  %s1588_s18 = smov 0  }
   0x6 LB: > { %s1603_s19 = sadd.s32 4294967295, %s1546_s18   ;;  %s1069_s20 = sadd.s32 4294967294, %s1546_s18   ;;  %s1546_s18 = sphi %s1588_s18, %s2165_s18   ;;  %s1542_s17 = sphi %s1586_s17, %s2164_s17   ;;  %s1538_s16 = sphi %s1584_s16, %s2163_s16   ;;  %s1534_s15 = sphi %s1582_s15, %s2162_s15  }
   0x7   : > { %s1607_s21 = sadd.s32 1, %s1546_s18   ;;  %s28_s22 = sadd.s32 1, %s1542_s17 }
   0x8   : > { %s25_s23 = ssub.s32 %s1546_s18, %s1607_s21  ;;  %p35_p0 = scmp.ne.s32.totalorder %s1542_s17, %s1538_s16 }
   0x9   : > { %p26_p1 = scmp.eq.s32.totalorder %s25_s23, 0  ;;  %p36_p2 = scmp.eq.s32.totalorder %s1546_s18, 0 }
   0xa   : > { %p41_p3 = scmp.ne.s32.totalorder %s1538_s16, %s1534_s15  ;;  %p2138_p4 = scmp.eq.s32.totalorder %s1603_s19, 0 }
   0xb   : > { %s1619_s24 = scalar_select %p26_p1, %s1542_s17, %s28_s22  }
   0xc   : > { %p1621_p5 = por %p36_p2, %p35_p0  ;;  %p1627_p6 = por %p2138_p4, %p41_p3 }
   0xd   : > { %p128_p7 = scmp.eq.s32.totalorder %s1603_s19, 1  ;;  %p134_p8 = scmp.eq.s32.totalorder %s1069_s20, 1 }
   0xe   : > { %s2141_s25 = scalar_select %p1621_p5, 1, 0 }
   0xf   : > { %s2142_s26 = scalar_select %p1627_p6, 1, 0 }
  0x10   : > { %p1070_p9 = scmp.ge.s32.totalorder %s1546_s18, 1  ;;  %p141_p10 = scmp.lt.s32.totalorder %s1546_s18, 3 }
  0x11   : > { %p1634_p11 = por %p128_p7, %p35_p0  ;;  %p1638_p12 = por %p134_p8, %p41_p3 }
  0x12   : > { %p1642_p13 = pnand %p1070_p9, %p141_p10  ;;  %s1548_s30 = smov [#allocation5]  }
  0x13   : > { %s2143_s27 = scalar_select %p1634_p11, 1, 0 }
  0x14   : > { %s2144_s28 = scalar_select %p1638_p12, 1, 0 }
  0x15   : > { %s2145_s29 = scalar_select %p1642_p13, 1, 0 }
  0x16   : > { %p1266_p1 = pneg %p1642_p13  ;;  %s153_s5 = sshll.u32 %s1548_s30, 4  ;;  %s154_s5 = int_to_ptr.vmem [resolvable:$true] %s153_s5 }
  0x17   : > { %s1420_s9 = scalar_lea.hbm %s2134_s1, 1024 }
  0x18   : > { %p1650_p2 = pnand %p1266_p1, %p2138_p4  ;;  %p1421_p0 = scmp.ne.s32.totalorder %s2134_s1, %s1420_s9 }
  0x19   : > { %p1427_p9 = scmp.lt.u32.totalorder %s1420_s9, %s2134_s1 }
  0x1a   : > { %p1422_p3 = pneg %p1650_p2 }
  0x1c   : > { %p1423_p7 = pnand %p1422_p3, %p1421_p0 }
  0x1e   : > { %p1424_p8 = pneg %p1423_p7 }
  0x20   : > { %p1429_p10 = pnand %p1427_p9, %p1424_p8 }
  0x22   : > { %1432 = shalt.err (!%p1429_p10)
}
  0x23   : > { %s1433_s14 = scalar_lea.vmem %s154_s5, 1024  ;;  %p1441_p11 = scmp.lt.s32.totalorder %s154_s5, %s154_s5 }
  0x24   : > { %p1434_p1 = scmp.ne.s32.totalorder %s154_s5, %s1433_s14  ;;  %p1442_p6 = scmp.lt.s32.totalorder %s1433_s14, %s1433_s14 }
  0x26   : > { %p1436_p4 = pnand %p1434_p1, %p1422_p3  ;;  %p1443_p13 = por %p1442_p6, %p1441_p11 }
  0x28   : > { %p1437_p12 = pneg %p1436_p4 }
  0x2a   : > { %p1444_p5 = pnand %p1443_p13, %p1437_p12 }
  0x2c   : > { %1447 = shalt.err (!%p1444_p5)
}
  0x2d   : > { %s1549_s20 = smov 64   ;;  %s1550_s22 = smov 4  }
  0x2e   : > { %1269 = dma.hbm_to_vmem [thread:$0]  (!%p1650_p2), %s2134_s1, 1024, %s154_s5, [#allocation6], %s1549_s20, %s1549_s20, %s1550_s22  }
  0x2f   : > { %p1072_p0 = scmp.ge.s32.totalorder %s1546_s18, 2 }
  0x30   : > { %p2147_p4 = scmp.ne.s32.totalorder (!%p1072_p0), %s2141_s25, 0 }
  0x31   : > { %169 = sbr.rel (%p1072_p0) target bundleno = 91 (0x5b), region = 28 }
  0x38   : > { %172 = sbr.rel (!%p2147_p4) target bundleno = 91 (0x5b), region = 32  ;;  %s173_s7 = sand.u32 (%p2147_p4), 1, %s1542_s17  }
  0x39   : > { %s178_s8 = smul.u32 (%p2147_p4), 48, %s1546_s18  ;;  %s1680_s11 = scalar_lea.sflag (%p2147_p4), [#allocation3], %s173_s7 }
  0x3a   : > { %s1257_s9 = smul.u32 (%p2147_p4), 384, %s173_s7 }
  0x3b   : > { %s179_s10 = ssub.s32 (%p2147_p4), 75, %s178_s8 }
  0x3c   : > { %p180_p5 = scmp.lt.s32.totalorder (%p2147_p4), %s179_s10, 48  ;;  %s177_s12 = scalar_lea.vmem (%p2147_p4), [#allocation2], %s1257_s9 }
  0x3f   : > { %s2167_s10 = smov (!%p180_p5, %s179_s10), 48 }
  0x40   : > { %s1677_s6 = sshll.u32 %s2167_s10, 7 }
  0x41   : > { %s184_s5 = ssub.s32 6144, %s1677_s6 }
  0x42   : > { %185 = vsyncadd %s1680_s11, %s184_s5  ;;  %p1074_p6 = scmp.ne.s32.totalorder %s1677_s6, 0  ;;  %s1096_s25 = smul.u32 6144, %s1546_s18 }
  0x43   : > { %s190_s13 = sshll.u32 %s177_s12, 4  ;;  %s1452_s8 = scalar_lea.hbm %s2133_s0, 9600  ;;  %s1690_s13 = int_to_ptr.vmem [resolvable:$true] %s190_s13 }
  0x44   : > { %s1688_s22 = scalar_lea.hbm %s2133_s0, %s1096_s25 }
  0x45   : > { %s1448_s23 = scalar_lea.hbm %s1688_s22, %s1677_s6  ;;  %p1453_p2 = scmp.lt.u32.totalorder %s1688_s22, %s2133_s0 }
  0x46   : > { %p1449_p11 = scmp.ne.s32.totalorder %s1688_s22, %s1448_s23  ;;  %p1454_p3 = scmp.lt.u32.totalorder %s1452_s8, %s1448_s23 }
  0x47   : > { %p1456_p8 = scmp.lt.u32.totalorder %s1448_s23, %s1688_s22 }
  0x48   : > { %p1450_p12 = pnand %p1449_p11, %p1074_p6  ;;  %p1455_p7 = por %p1454_p3, %p1453_p2 }
  0x4a   : > { %p1451_p13 = pneg %p1450_p12  ;;  %p1457_p9 = por %p1456_p8, %p1455_p7 }
  0x4c   : > { %p1458_p10 = pnand %p1457_p9, %p1451_p13 }
  0x4e   : > { %1461 = shalt.err (!%p1458_p10)
}
  0x4f   : > { %s1462_s5 = scalar_lea.vmem %s1690_s13, %s1677_s6  ;;  %s1551_s12 = smov [#allocation2]  }
  0x50   : > { %p1463_p1 = scmp.ne.s32.totalorder %s1690_s13, %s1462_s5  ;;  %s1466_s25 = sshll.u32 %s1551_s12, 4  ;;  %s1467_s25 = int_to_ptr.vmem [resolvable:$false] %s1466_s25 }
  0x51   : > { %s1468_s14 = scalar_lea.vmem %s1467_s25, 12288  ;;  %p1469_p11 = scmp.lt.s32.totalorder %s1690_s13, %s1467_s25 }
  0x52   : > { %p1464_p4 = pnand %p1463_p1, %p1074_p6  ;;  %p1470_p12 = scmp.lt.s32.totalorder %s1468_s14, %s1462_s5 }
  0x54   : > { %p1465_p5 = pneg %p1464_p4  ;;  %p1471_p2 = por %p1470_p12, %p1469_p11 }
  0x56   : > { %p1472_p3 = pnand %p1471_p2, %p1465_p5 }
  0x58   : > { %1475 = shalt.err (!%p1472_p3)
}
  0x59   : > { %s1552_s20 = smov 128   ;;  %s1553_s23 = smov 8  }
  0x5a   : > { %196 = dma.hbm_to_vmem [thread:$0]  (%p1074_p6), %s1688_s22, %s1677_s6, %s1690_s13, %s1680_s11, %s1552_s20, %s1552_s20, %s1553_s23  }
  0x5b PF: > { %p2148_p13 = scmp.ne.s32.totalorder %s2145_s29, 0 }
  0x5c   : > { %s1720_s30 = sand.u32 (!%p2148_p13), 1, %s1538_s16   ;;  %p2149_p7 = scmp.ne.s32.totalorder (!%p2148_p13), %s2142_s26, 0 }
  0x5d   : > { %202 = sbr.rel (%p2148_p13) target bundleno = 720 (0x2d0), region = 36  ;;  %s205_s8 = scalar_lea.sflag (!%p2148_p13), [#allocation3], %s1720_s30 }
  0x5e   : > { %s1258_s7 = smul.u32 (!%p2148_p13), 384, %s1720_s30 }
  0x60   : > { %s1724_s9 = scalar_lea.vmem (!%p2148_p13), [#allocation2], %s1258_s7 }
  0x64   : > { %1521 = dma.done.wait (%p2149_p7), %s205_s8, 6144  }
  0x65   : > { %1523 = vsyncadd (%p2149_p7), %s205_s8, 4294961152  ;;  %p2150_p6 = scmp.eq.s32.totalorder %s1603_s19, 0 }
  0x67   : > { %1525 = dma.done.wait (%p2150_p6), [#allocation6], 1024   ;;  %p2151_p8 = pmov %p2150_p6 }
  0x68   : > { %v1316_v0 = vld [vmem:[#allocation5] sm:$0xff]   ;;  %v1317_v1 = vld [vmem:[#allocation5 + $0x8] sm:$0xff]   ;;  %v1318_v2 = vld [vmem:[#allocation5 + $0x10] sm:$0xff]   ;;  %vm1555_vm0 = vmmov 0   ;;  %s1259_s13 = smul.u32 12, %s1720_s30  ;;  %s969_s10 = scalar_lea.sflag [#allocation4], %s1720_s30 }
  0x69   : > { %1527 = vsyncadd (%p2151_p8), [#allocation6], 4294966272  ;;  %1157 = vmatprep.subr.bf16.mxu0 %v1316_v0  ;;  %1241 = vmatprep.subr.bf16.mxu1 %v1316_v0  ;;  %v1319_v3 = vld [vmem:[#allocation5 + $0x18] sm:$0xff]   ;;  %v248_v4 = vld [vmem:[%s1724_s9] sm:$0xff]  ;;  %p2160_p9 = scmp.ne.s32.totalorder %s2143_s27, 0 }
  0x6a   : > { %1158 = vmatpush3.bf16.msra.mxu0 %v1316_v0  ;;  %1249 = vmatpush3.bf16.msra.mxu1 %v1316_v0  ;;  %v249_v5 = vld [vmem:[%s1724_s9 + $0x8] sm:$0xff]  ;;  %v280_v7 = vld [vmem:[%s1724_s9 + $0x100] sm:$0xff]  ;;  %v1322_v12 = vld [vmem:[#allocation5 + $0x30] sm:$0xff]   ;;  %s236_s22 = scalar_lea.vmem [#allocation7], %s1259_s13  ;;  %s976_s5 = smul.u32 (%p2160_p9), 3, %s1603_s19 }
  0x6b   : > { %1159 = vmatprep.subr.bf16.mxu0 %v1317_v1  ;;  %1242 = vmatprep.subr.bf16.mxu1 %v1317_v1  ;;  %v296_v6 = vpack.c.bf16 %v249_v5, %v248_v4  ;;  %v281_v8 = vld [vmem:[%s1724_s9 + $0x108] sm:$0xff]  ;;  %v1320_v9 = vld [vmem:[#allocation5 + $0x20] sm:$0xff]   ;;  %v1323_v13 = vld [vmem:[#allocation5 + $0x38] sm:$0xff]  }
  0x6c   : > { %v312_v10 = vpack.c.bf16 %v281_v8, %v280_v7  ;;  %v1321_v11 = vld [vmem:[#allocation5 + $0x28] sm:$0xff]   ;;  %v250_v14 = vld [vmem:[%s1724_s9 + $0x10] sm:$0xff]  ;;  %v251_v15 = vld [vmem:[%s1724_s9 + $0x18] sm:$0xff]  ;;  %s977_s12 = ssub.s32 (%p2160_p9), 5, %s976_s5 }
  0x6d   : > { %1173 = vmatprep.mubr.bf16.mxu0 %v296_v6  ;;  %v252_v16 = vld [vmem:[%s1724_s9 + $0x20] sm:$0xff]  ;;  %v282_v17 = vld [vmem:[%s1724_s9 + $0x110] sm:$0xff]  ;;  %v283_v18 = vld [vmem:[%s1724_s9 + $0x118] sm:$0xff]  ;;  %v297_v22 = vpack.c.bf16 %v251_v15, %v250_v14  ;;  %p978_p10 = scmp.lt.s32.totalorder (%p2160_p9), %s977_s12, 3 }
  0x6e   : > { %1160 = vmatpush3.bf16.msra.mxu0 %v1317_v1  ;;  %1250 = vmatpush3.bf16.msra.mxu1 %v1317_v1  ;;  %v253_v19 = vld [vmem:[%s1724_s9 + $0x28] sm:$0xff]  ;;  %v284_v20 = vld [vmem:[%s1724_s9 + $0x120] sm:$0xff]  ;;  %v313_v23 = vpack.c.bf16 %v283_v18, %v282_v17  ;;  %v254_v26 = vld [vmem:[%s1724_s9 + $0x30] sm:$0xff] }
  0x6f   : > { %1161 = vmatprep.subr.bf16.mxu0 %v1318_v2  ;;  %1243 = vmatprep.subr.bf16.mxu1 %v1318_v2  ;;  %v285_v21 = vld [vmem:[%s1724_s9 + $0x128] sm:$0xff]  ;;  %v298_v24 = vpack.c.bf16 %v253_v19, %v252_v16  ;;  %v255_v27 = vld [vmem:[%s1724_s9 + $0x38] sm:$0xff]  ;;  %v256_v28 = vld [vmem:[%s1724_s9 + $0x40] sm:$0xff]  ;;  %v1554_v16 = vmov 0.0  }
  0x70   : > { %1205 = vmatprep.mubr.bf16.mxu1 %v312_v10  ;;  %v314_v25 = vpack.c.bf16 %v285_v21, %v284_v20  ;;  %v286_v29 = vld [vmem:[%s1724_s9 + $0x130] sm:$0xff]  ;;  %v287_v30 = vld [vmem:[%s1724_s9 + $0x138] sm:$0xff]  ;;  %v257_v31 = vld [vmem:[%s1724_s9 + $0x48] sm:$0xff]  ;;  %v299_v34 = vpack.c.bf16 %v255_v27, %v254_v26 }
  0x71   : > { %v288_v32 = vld [vmem:[%s1724_s9 + $0x140] sm:$0xff]  ;;  %v289_v33 = vld [vmem:[%s1724_s9 + $0x148] sm:$0xff]  ;;  %v315_v35 = vpack.c.bf16 %v287_v30, %v286_v29  ;;  %v300_v36 = vpack.c.bf16 %v257_v31, %v256_v28  ;;  %v258_v38 = vld [vmem:[%s1724_s9 + $0x50] sm:$0xff] }
  0x72   : > { %1162 = vmatpush3.bf16.msra.mxu0 %v1318_v2  ;;  %1251 = vmatpush3.bf16.msra.mxu1 %v1318_v2  ;;  %v316_v37 = vpack.c.bf16 %v289_v33, %v288_v32  ;;  %v259_v39 = vld [vmem:[%s1724_s9 + $0x58] sm:$0xff]  ;;  %v260_v40 = vld [vmem:[%s1724_s9 + $0x60] sm:$0xff]  ;;  %v290_v41 = vld [vmem:[%s1724_s9 + $0x150] sm:$0xff] }
  0x73   : > { %1163 = vmatprep.subr.bf16.mxu0 %v1319_v3  ;;  %1244 = vmatprep.subr.bf16.mxu1 %v1319_v3  ;;  %v291_v42 = vld [vmem:[%s1724_s9 + $0x158] sm:$0xff]  ;;  %v261_v43 = vld [vmem:[%s1724_s9 + $0x68] sm:$0xff]  ;;  %v292_v44 = vld [vmem:[%s1724_s9 + $0x160] sm:$0xff]  ;;  %v301_v46 = vpack.c.bf16 %v259_v39, %v258_v38 }
  0x74   : > { %v293_v45 = vld [vmem:[%s1724_s9 + $0x168] sm:$0xff]  ;;  %v317_v47 = vpack.c.bf16 %v291_v42, %v290_v41  ;;  %v302_v48 = vpack.c.bf16 %v261_v43, %v260_v40  ;;  %v262_v50 = vld [vmem:[%s1724_s9 + $0x70] sm:$0xff]  ;;  %v263_v51 = vld [vmem:[%s1724_s9 + $0x78] sm:$0xff] }
  0x75   : > { %v318_v49 = vpack.c.bf16 %v293_v45, %v292_v44  ;;  %v294_v52 = vld [vmem:[%s1724_s9 + $0x170] sm:$0xff]  ;;  %v295_v53 = vld [vmem:[%s1724_s9 + $0x178] sm:$0xff]  ;;  %v264_v54 = vld [vmem:[%s1724_s9 + $0x80] sm:$0xff]  ;;  %v303_v56 = vpack.c.bf16 %v263_v51, %v262_v50 }
  0x76   : > { %1164 = vmatpush3.bf16.msra.mxu0 %v1319_v3  ;;  %1252 = vmatpush3.bf16.msra.mxu1 %v1319_v3  ;;  %v265_v55 = vld [vmem:[%s1724_s9 + $0x88] sm:$0xff]  ;;  %v319_v57 = vpack.c.bf16 %v295_v53, %v294_v52  ;;  %v266_v59 = vld [vmem:[%s1724_s9 + $0x90] sm:$0xff]  ;;  %v267_v60 = vld [vmem:[%s1724_s9 + $0x98] sm:$0xff] }
  0x77   : > { %1165 = vmatprep.subr.bf16.mxu0 %v1320_v9  ;;  %1245 = vmatprep.subr.bf16.mxu1 %v1320_v9  ;;  %v304_v58 = vpack.c.bf16 %v265_v55, %v264_v54  ;;  %v268_v61 = vld [vmem:[%s1724_s9 + $0xa0] sm:$0xff]  ;;  %v269_v62 = vld [vmem:[%s1724_s9 + $0xa8] sm:$0xff]  ;;  %v305_v63 = vpack.c.bf16 %v267_v60, %v266_v59  ;;  %v270_v1 = vld [vmem:[%s1724_s9 + $0xb0] sm:$0xff] }
  0x78   : > { %v306_v0 = vpack.c.bf16 %v269_v62, %v268_v61  ;;  %v271_v2 = vld [vmem:[%s1724_s9 + $0xb8] sm:$0xff]  ;;  %v272_v3 = vld [vmem:[%s1724_s9 + $0xc0] sm:$0xff]  ;;  %v273_v4 = vld [vmem:[%s1724_s9 + $0xc8] sm:$0xff] }
  0x79   : > { %v307_v5 = vpack.c.bf16 %v271_v2, %v270_v1  ;;  %v308_v6 = vpack.c.bf16 %v273_v4, %v272_v3  ;;  %v274_v7 = vld [vmem:[%s1724_s9 + $0xd0] sm:$0xff]  ;;  %v275_v8 = vld [vmem:[%s1724_s9 + $0xd8] sm:$0xff]  ;;  %v277_v10 = vld [vmem:[%s1724_s9 + $0xe8] sm:$0xff] }
  0x7a   : > { %1166 = vmatpush3.bf16.msra.mxu0 %v1320_v9  ;;  %1253 = vmatpush3.bf16.msra.mxu1 %v1320_v9  ;;  %v276_v9 = vld [vmem:[%s1724_s9 + $0xe0] sm:$0xff]  ;;  %v279_v14 = vld [vmem:[%s1724_s9 + $0xf8] sm:$0xff] }
  0x7b   : > { %1167 = vmatprep.subr.bf16.mxu0 %v1321_v11  ;;  %1246 = vmatprep.subr.bf16.mxu1 %v1321_v11  ;;  %v1786_v17 = vld [vmem:[%s2136_s3] sm:$0x3] }
  0x7c   : > { %v1793_v18 = vld [vmem:[%s2135_s2] ss:$0 sm:$0xff] }
  0x7e   : > { %1168 = vmatpush3.bf16.msra.mxu0 %v1321_v11  ;;  %1254 = vmatpush3.bf16.msra.mxu1 %v1321_v11  ;;  %v309_v11 = vpack.c.bf16 %v275_v8, %v274_v7 }
  0x7f   : > { %1169 = vmatprep.subr.bf16.mxu0 %v1322_v12  ;;  %1247 = vmatprep.subr.bf16.mxu1 %v1322_v12 }
  0x82   : > { %1170 = vmatpush3.bf16.msra.mxu0 %v1322_v12  ;;  %1255 = vmatpush3.bf16.msra.mxu1 %v1322_v12  ;;  %v310_v12 = vpack.c.bf16 %v277_v10, %v276_v9 }
  0x83   : > { %1171 = vmatprep.subr.bf16.mxu0 %v1323_v13  ;;  %1248 = vmatprep.subr.bf16.mxu1 %v1323_v13 }
  0x86   : > { %1172 = vmatpush3.bf16.msra.mxu0 %v1323_v13  ;;  %1256 = vmatpush3.bf16.msra.mxu1 %v1323_v13  ;;  %v278_v13 = vld [vmem:[%s1724_s9 + $0xf0] sm:$0xff] }
  0x87   : > { %v311_v15 = vpack.c.bf16 %v279_v14, %v278_v13  ;;  %1221 = vmatprep.subr.bf16.mxu0 %v1554_v16 }
  0x89   : > { %1174 = vmatmul.mubr.bf16.vlgmr.msra.gmra.mrb[0].mxu0 %v297_v22  ;;  %1206 = vmatmul.mubr.bf16.vlgmr.msra.gmra.mrb[0].mxu1 %v313_v23 }
  0x8a   : > { %1177 = vmatprep.mubr.bf16.mxu0 %v298_v24  ;;  %1209 = vmatprep.mubr.bf16.mxu1 %v314_v25 }
  0x91   : > { %1178 = vmatmul.mubr.bf16.gmra.mrb[4].mxu0 %v299_v34  ;;  %1210 = vmatmul.mubr.bf16.gmra.mrb[4].mxu1 %v315_v35 }
  0x92   : > { %1181 = vmatprep.mubr.bf16.mxu0 %v300_v36  ;;  %1213 = vmatprep.mubr.bf16.mxu1 %v316_v37 }
  0x99   : > { %1182 = vmatmul.mubr.bf16.gmra.mrb[8].mxu0 %v301_v46  ;;  %1214 = vmatmul.mubr.bf16.gmra.mrb[8].mxu1 %v317_v47 }
  0x9a   : > { %1185 = vmatprep.mubr.bf16.mxu0 %v302_v48  ;;  %1217 = vmatprep.mubr.bf16.mxu1 %v318_v49 }
  0xa1   : > { %1186 = vmatmul.mubr.bf16.gmra.mrb[12].mxu0 %v303_v56  ;;  %1218 = vmatmul.mubr.bf16.gmra.mrb[12].mxu1 %v319_v57 }
  0xa2   : > { %1189 = vmatprep.mubr.bf16.mxu0 %v304_v58  ;;  %1146 = vmatprep.mubr.bf16.mxu1 %v1786_v17 }
  0xa9   : > { %1190 = vmatmul.mubr.bf16.gmra.mrb[16].mxu0 %v305_v63 }
  0xaa   : > { %1193 = vmatprep.mubr.bf16.mxu0 %v306_v0 }
  0xb1   : > { %1194 = vmatmul.mubr.bf16.gmra.mrb[20].mxu0 %v307_v5 }
  0xb2   : > { %1197 = vmatprep.mubr.bf16.mxu0 %v308_v6 }
  0xb9   : > { %1198 = vmatmul.mubr.bf16.gmra.mrb[24].mxu0 %v309_v11 }
  0xba   : > { %1201 = vmatprep.mubr.bf16.mxu0 %v310_v12 }
  0xc1   : > { %1202 = vmatmul.mubr.bf16.gmra.mrb[28].mxu0 %v311_v15 }
  0xc2   : > { %1237 = vmatprep.mubr.msk.bf16.mxu0 %vm1555_vm0, %v1554_v16 }
 0x15c   : > { %v1175_v19 = vpop.f32.mrb[0].mxu0  ;;  %v1207_v20 = vpop.f32.mrb[0].mxu1 }
 0x15d   : > { %v434_v21 = vadd.f32 %v1175_v19, %v1793_v18  ;;  %v425_v22 = vpop.f32.mrb[1].mxu0  ;;  %v562_v23 = vadd.f32 %v1207_v20, %v1793_v18  ;;  %v553_v24 = vpop.f32.mrb[1].mxu1 }
 0x15e   : > { %v426_v25 = vadd.f32 %v1793_v18, %v425_v22  ;;  %v1176_v26 = vpop.f32.mrb[2].mxu0  ;;  %v554_v27 = vadd.f32 %v1793_v18, %v553_v24  ;;  %v1208_v28 = vpop.f32.mrb[2].mxu1 }
 0x15f   : > { %v666_v29 = vmul.f32 0.70710677, %v434_v21  ;;  %v437_v30 = vadd.f32 %v1176_v26, %v1793_v18  ;;  %v428_v31 = vpop.f32.mrb[3].mxu0  ;;  %v556_v32 = vpop.f32.mrb[3].mxu1  ;;  %v698_v36 = vmul.f32 0.70710677, %v562_v23  ;;  %v565_v39 = vadd.f32 %v1208_v28, %v1793_v18 }
 0x160   : > { %v664_v33 = vmul.f32 0.70710677, %v426_v25  ;;  %v429_v34 = vadd.f32 %v1793_v18, %v428_v31  ;;  %v696_v38 = vmul.f32 0.70710677, %v554_v27  ;;  %v557_v40 = vadd.f32 %v1793_v18, %v556_v32 }
 0x161   : > { %1324 = verf.f32 %v666_v29  ;;  %v667_v35 = vmul.f32 0.70710677, %v437_v30  ;;  %v699_v45 = vmul.f32 0.70710677, %v565_v39  ;;  %v618_v51 = vmul.f32 0.5, %v434_v21 }
 0x162   : > { %1326 = verf.f32 %v664_v33  ;;  %v665_v37 = vmul.f32 0.70710677, %v429_v34  ;;  %v697_v49 = vmul.f32 0.70710677, %v557_v40  ;;  %v650_v57 = vmul.f32 0.5, %v562_v23 }
 0x163   : > { %1328 = verf.f32 %v667_v35  ;;  %v616_v59 = vmul.f32 0.5, %v426_v25  ;;  %v619_v62 = vmul.f32 0.5, %v437_v30  ;;  %v617_v2 = vmul.f32 0.5, %v429_v34 }
 0x164   : > { %1330 = verf.f32 %v665_v37  ;;  %v1179_v41 = vpop.f32.mrb[4].mxu0  ;;  %v1211_v42 = vpop.f32.mrb[4].mxu1  ;;  %v648_v3 = vmul.f32 0.5, %v554_v27  ;;  %v651_v7 = vmul.f32 0.5, %v565_v39  ;;  %v649_v8 = vmul.f32 0.5, %v557_v40 }
 0x165   : > { %v450_v43 = vadd.f32 %v1179_v41, %v1793_v18  ;;  %v441_v44 = vpop.f32.mrb[5].mxu0  ;;  %1332 = verf.f32 %v698_v36  ;;  %v569_v46 = vpop.f32.mrb[5].mxu1  ;;  %v1814_v61 = vadd.f32 %v1211_v42, %v1793_v18 }
 0x166   : > { %v442_v47 = vadd.f32 %v1793_v18, %v441_v44  ;;  %v1180_v48 = vpop.f32.mrb[6].mxu0  ;;  %1334 = verf.f32 %v696_v38  ;;  %v1805_v50 = vpop.f32.mrb[6].mxu1  ;;  %v1818_v0 = vadd.f32 %v1793_v18, %v569_v46 }
 0x167   : > { %v670_v52 = vmul.f32 0.70710677, %v450_v43  ;;  %v453_v53 = vadd.f32 %v1180_v48, %v1793_v18  ;;  %v444_v54 = vpop.f32.mrb[7].mxu0  ;;  %1336 = verf.f32 %v699_v45  ;;  %v1808_v55 = vpop.f32.mrb[7].mxu1  ;;  %v702_v4 = vmul.f32 0.70710677, %v1814_v61 }
 0x168   : > { %v668_v56 = vmul.f32 0.70710677, %v442_v47  ;;  %v1811_v58 = vadd.f32 %v1793_v18, %v444_v54  ;;  %1338 = verf.f32 %v697_v49  ;;  %v1823_v13 = vmul.f32 0.5, %v450_v43 }
 0x169   : > { %1340 = verf.f32 %v670_v52  ;;  %v671_v60 = vmul.f32 0.70710677, %v453_v53  ;;  %v1825_v14 = vmul.f32 0.5, %v442_v47  ;;  %v623_v23 = vmul.f32 0.5, %v453_v53 }
 0x16a   : > { %1342 = verf.f32 %v668_v56  ;;  %v669_v63 = vmul.f32 0.70710677, %v1811_v58  ;;  %v700_v26 = vmul.f32 0.70710677, %v1818_v0 }
 0x16b   : > { %v1325_v1 = vpop.eup %1324  ;;  %1344 = verf.f32 %v671_v60 }
 0x16c   : > { %v1327_v5 = vpop.eup %1326  ;;  %v762_v6 = vadd.f32 1.0, %v1325_v1  ;;  %1346 = verf.f32 %v669_v63  ;;  %v1183_v9 = vpop.f32.mrb[8].mxu0  ;;  %v621_v1 = vmul.f32 0.5, %v1811_v58  ;;  %v1872_v58 = vmul.f32 0.5, %v1818_v0 }
 0x16d   : > { %v1821_v10 = vpop.f32.mrb[8].mxu1  ;;  %v1329_v11 = vpop.eup %1328  ;;  %v760_v12 = vadd.f32 1.0, %v1327_v5  ;;  %v1828_v15 = vadd.f32 %v1183_v9, %v1793_v18  ;;  %1348 = verf.f32 %v702_v4 }
 0x16e   : > { %v457_v19 = vpop.f32.mrb[9].mxu0  ;;  %v1830_v20 = vpop.f32.mrb[9].mxu1  ;;  %v763_v22 = vadd.f32 1.0, %v1329_v11  ;;  %v1838_v29 = vmul.f32 %v762_v6, %v618_v51  ;;  %v654_v11 = vmul.f32 0.5, %v1814_v61 }
 0x16f   : > { %v1331_v21 = vpop.eup %1330  ;;  %v1833_v24 = vadd.f32 %v1793_v18, %v457_v19  ;;  %v1184_v25 = vpop.f32.mrb[10].mxu0  ;;  %v674_v31 = vmul.f32 0.70710677, %v1828_v15  ;;  %v1843_v35 = vmul.f32 %v760_v12, %v616_v59 }
 0x170   : > { %v1836_v27 = vpop.f32.mrb[10].mxu1  ;;  %v1333_v28 = vpop.eup %1332  ;;  %v761_v30 = vadd.f32 1.0, %v1331_v21  ;;  %v1845_v36 = vmul.f32 %v763_v22, %v619_v62  ;;  %v469_v42 = vadd.f32 %v1184_v25, %v1793_v18  ;;  %v581_v25 = vadd.f32 %v1805_v50, %v1793_v18 }
 0x171   : > { %v460_v32 = vpop.f32.mrb[11].mxu0  ;;  %v1841_v33 = vpop.f32.mrb[11].mxu1  ;;  %v794_v37 = vadd.f32 1.0, %v1333_v28  ;;  %v672_v38 = vmul.f32 0.70710677, %v1833_v24  ;;  %1350 = verf.f32 %v674_v31 }
 0x172   : > { %v1335_v34 = vpop.eup %1334  ;;  %v1848_v40 = vmul.f32 %v761_v30, %v617_v2  ;;  %1352 = verf.f32 %v700_v26  ;;  %v675_v56 = vmul.f32 0.70710677, %v469_v42  ;;  %v461_v59 = vadd.f32 %v1793_v18, %v460_v32 }
 0x173   : > { %v1337_v39 = vpop.eup %1336  ;;  %v792_v41 = vadd.f32 1.0, %v1335_v34  ;;  %v1853_v45 = vmul.f32 %v794_v37, %v650_v57  ;;  %1354 = verf.f32 %v672_v38 }
 0x174   : > { %v1339_v43 = vpop.eup %1338  ;;  %v795_v46 = vadd.f32 1.0, %v1337_v39  ;;  %v1187_v60 = vpop.f32.mrb[12].mxu0  ;;  %1356 = verf.f32 %v675_v56  ;;  %v673_v61 = vmul.f32 0.70710677, %v461_v59 }
 0x175   : > { %v1341_v47 = vpop.eup %1340  ;;  %v840_v49 = vmul.f32 %v792_v41, %v648_v3  ;;  %v793_v51 = vadd.f32 1.0, %v1339_v43  ;;  %v1860_v62 = vpop.f32.mrb[12].mxu1  ;;  %v482_v4 = vadd.f32 %v1187_v60, %v1793_v18  ;;  %v703_v43 = vmul.f32 0.70710677, %v581_v25 }
 0x176   : > { %v1343_v52 = vpop.eup %1342  ;;  %v766_v53 = vadd.f32 1.0, %v1341_v47  ;;  %v1857_v54 = vmul.f32 %v795_v46, %v651_v7  ;;  %v473_v3 = vpop.f32.mrb[13].mxu0  ;;  %1358 = verf.f32 %v673_v61  ;;  %v626_v46 = vmul.f32 0.5, %v1828_v15 }
 0x177   : > { %v1345_v57 = vpop.eup %1344  ;;  %v764_v63 = vadd.f32 1.0, %v1343_v52  ;;  %v841_v2 = vmul.f32 %v793_v51, %v649_v8  ;;  %v1864_v5 = vpop.f32.mrb[13].mxu1  ;;  %v678_v31 = vmul.f32 0.70710677, %v482_v4  ;;  %v474_v0 = vadd.f32 %v1793_v18, %v473_v3 }
 0x178   : > { %v1347_v6 = vpop.eup %1346  ;;  %v767_v9 = vadd.f32 1.0, %v1345_v57  ;;  %v874_v7 = vpack.c.bf16 %v1857_v54, %v1853_v45  ;;  %v1188_v12 = vpop.f32.mrb[14].mxu0  ;;  %v1879_v28 = vmul.f32 %v766_v53, %v1823_v13  ;;  %v624_v47 = vmul.f32 0.5, %v1833_v24 }
 0x179   : > { %v1869_v19 = vpop.f32.mrb[14].mxu1  ;;  %v765_v21 = vadd.f32 1.0, %v1347_v6  ;;  %v873_v22 = vpack.c.bf16 %v841_v2, %v840_v49  ;;  %v476_v8 = vpop.f32.mrb[15].mxu0  ;;  %v1884_v34 = vmul.f32 %v764_v63, %v1825_v14  ;;  %v485_v38 = vadd.f32 %v1188_v12, %v1793_v18 }
 0x17a   : > { %v1876_v26 = vpop.f32.mrb[15].mxu1  ;;  %v1881_v30 = vmul.f32 %v767_v9, %v623_v23  ;;  %v1349_v32 = vpop.eup %1348  ;;  %v477_v13 = vadd.f32 %v1793_v18, %v476_v8  ;;  %v1893_v23 = vmul.f32 0.5, %v581_v25  ;;  %1360 = verf.f32 %v678_v31 }
 0x17b   : > { %v1886_v37 = vmul.f32 %v765_v21, %v621_v1  ;;  %1222 = vmatpush3.bf16.xpose.msra.mxu0 %v873_v22  ;;  %v1351_v39 = vpop.eup %1350  ;;  %v676_v41 = vmul.f32 0.70710677, %v474_v0  ;;  %v627_v49 = vmul.f32 0.5, %v469_v42  ;;  %v679_v51 = vmul.f32 0.70710677, %v485_v38 }
 0x17c   : > { %1223 = vmatprep.subr.bf16.mxu0 %v1554_v16  ;;  %v1353_v45 = vpop.eup %1352  ;;  %v1191_v52 = vpop.f32.mrb[16].mxu0  ;;  %v625_v54 = vmul.f32 0.5, %v461_v59  ;;  %v1900_v56 = vmul.f32 0.5, %v482_v4  ;;  %v798_v60 = vadd.f32 1.0, %v1349_v32  ;;  %v770_v63 = vadd.f32 1.0, %v1351_v39 }
 0x17d   : > { %v1355_v53 = vpop.eup %1354  ;;  %1362 = verf.f32 %v676_v41  ;;  %v489_v57 = vpop.f32.mrb[17].mxu0  ;;  %v677_v1 = vmul.f32 0.70710677, %v477_v13  ;;  %v573_v2 = vadd.f32 %v1793_v18, %v1808_v55  ;;  %v796_v15 = vadd.f32 1.0, %v1353_v45 }
 0x17e   : > { %1364 = verf.f32 %v679_v51  ;;  %v1192_v3 = vpop.f32.mrb[18].mxu0  ;;  %v498_v24 = vadd.f32 %v1191_v52, %v1793_v18  ;;  %v490_v42 = vadd.f32 %v1793_v18, %v489_v57  ;;  %v1357_v59 = vpop.eup %1356  ;;  %v628_v4 = vmul.f32 0.5, %v474_v0 }
 0x17f   : > { %1366 = verf.f32 %v703_v43  ;;  %v492_v6 = vpop.f32.mrb[19].mxu0  ;;  %v701_v9 = vmul.f32 0.70710677, %v573_v2  ;;  %v501_v12 = vadd.f32 %v1192_v3, %v1793_v18  ;;  %v768_v21 = vadd.f32 1.0, %v1355_v53 }
 0x180   : > { %1368 = verf.f32 %v677_v1  ;;  %v771_v22 = vadd.f32 1.0, %v1357_v59  ;;  %v1907_v8 = vmul.f32 %v798_v60, %v654_v11  ;;  %v682_v25 = vmul.f32 0.70710677, %v498_v24  ;;  %v1359_v11 = vpop.eup %1358 }
 0x181   : > { %v1909_v55 = vmul.f32 %v770_v63, %v626_v46  ;;  %1370 = verf.f32 %v701_v9  ;;  %v680_v61 = vmul.f32 0.70710677, %v490_v42  ;;  %v683_v31 = vmul.f32 0.70710677, %v501_v12 }
 0x182   : > { %v1912_v32 = vmul.f32 %v771_v22, %v627_v49  ;;  %1372 = verf.f32 %v682_v25  ;;  %v1915_v0 = vadd.f32 %v1793_v18, %v492_v6  ;;  %v1919_v39 = vadd.f32 %v1821_v10, %v1793_v18 }
 0x183   : > { %1224 = vmatpush3.bf16.xpose.msra.mxu0 %v874_v7  ;;  %v631_v41 = vmul.f32 0.5, %v485_v38  ;;  %v1922_v7 = vmul.f32 %v796_v15, %v1872_v58  ;;  %v629_v43 = vmul.f32 0.5, %v477_v13  ;;  %1374 = verf.f32 %v680_v61 }
 0x184   : > { %1225 = vmatprep.subr.bf16.mxu0 %v1554_v16  ;;  %v1195_v45 = vpop.f32.mrb[20].mxu0  ;;  %v1361_v46 = vpop.eup %1360  ;;  %v1924_v51 = vmul.f32 %v768_v21, %v624_v47  ;;  %v769_v52 = vadd.f32 1.0, %v1359_v11  ;;  %1376 = verf.f32 %v683_v31  ;;  %v653_v10 = vmul.f32 0.5, %v573_v2 }
 0x185   : > { %v505_v53 = vpop.f32.mrb[21].mxu0  ;;  %v774_v60 = vadd.f32 1.0, %v1361_v46  ;;  %v681_v57 = vmul.f32 0.70710677, %v1915_v0  ;;  %v514_v38 = vadd.f32 %v1195_v45, %v1793_v18  ;;  %v1932_v1 = vmul.f32 0.5, %v498_v24 }
 0x186   : > { %v1196_v58 = vpop.f32.mrb[22].mxu0  ;;  %v1930_v13 = vmul.f32 %v769_v52, %v625_v54  ;;  %v1934_v47 = vmul.f32 0.5, %v490_v42  ;;  %v706_v3 = vmul.f32 0.70710677, %v1919_v39  ;;  %v506_v2 = vadd.f32 %v1793_v18, %v505_v53 }
 0x187   : > { %v1363_v63 = vpop.eup %1362  ;;  %v508_v15 = vpop.f32.mrb[23].mxu0  ;;  %1378 = verf.f32 %v681_v57  ;;  %v517_v9 = vadd.f32 %v1196_v58, %v1793_v18  ;;  %v686_v25 = vmul.f32 0.70710677, %v514_v38  ;;  %v586_v24 = vadd.f32 %v1793_v18, %v1830_v20 }
 0x188   : > { %v1365_v6 = vpop.eup %1364  ;;  %v772_v59 = vadd.f32 1.0, %v1363_v63  ;;  %v1944_v61 = vmul.f32 %v774_v60, %v1900_v56  ;;  %v1946_v11 = vmul.f32 0.5, %v501_v12  ;;  %v1950_v45 = vadd.f32 %v1836_v27, %v1793_v18 }
 0x189   : > { %v1367_v21 = vpop.eup %1366  ;;  %v775_v54 = vadd.f32 1.0, %v1365_v6  ;;  %1380 = verf.f32 %v706_v3  ;;  %v684_v56 = vmul.f32 0.70710677, %v506_v2  ;;  %v687_v60 = vmul.f32 0.70710677, %v517_v9 }
 0x18a   : > { %v1369_v42 = vpop.eup %1368  ;;  %v799_v31 = vadd.f32 1.0, %v1367_v21  ;;  %v1952_v46 = vmul.f32 %v772_v59, %v628_v4  ;;  %1382 = verf.f32 %v686_v25  ;;  %v704_v6 = vmul.f32 0.70710677, %v586_v24 }
 0x18b   : > { %v1954_v52 = vmul.f32 %v775_v54, %v631_v41  ;;  %v773_v53 = vadd.f32 1.0, %v1369_v42  ;;  %v1371_v57 = vpop.eup %1370  ;;  %1384 = verf.f32 %v687_v60  ;;  %v589_v21 = vadd.f32 %v1793_v18, %v1841_v33 }
 0x18c   : > { %v1957_v20 = vmul.f32 %v799_v31, %v1893_v23  ;;  %v1199_v58 = vpop.f32.mrb[24].mxu0  ;;  %v1373_v12 = vpop.eup %1372  ;;  %v797_v4 = vadd.f32 1.0, %v1371_v57  ;;  %v509_v23 = vadd.f32 %v1793_v18, %v508_v15  ;;  %v633_v31 = vmul.f32 0.5, %v1915_v0 }
 0x18d   : > { %v1961_v27 = vmul.f32 %v773_v53, %v629_v43  ;;  %v521_v41 = vpop.f32.mrb[25].mxu0  ;;  %v1375_v59 = vpop.eup %1374  ;;  %1386 = verf.f32 %v704_v6  ;;  %v1971_v57 = vmul.f32 0.5, %v514_v38  ;;  %v1974_v60 = vmul.f32 0.5, %v1919_v39 }
 0x18e   : > { %v876_v3 = vpack.c.bf16 %v1957_v20, %v1907_v8  ;;  %v1200_v54 = vpop.f32.mrb[26].mxu0  ;;  %v1377_v25 = vpop.eup %1376  ;;  %v845_v43 = vmul.f32 %v797_v4, %v653_v10  ;;  %1388 = verf.f32 %v684_v56  ;;  %v685_v15 = vmul.f32 0.70710677, %v509_v23 }
 0x18f   : > { %v524_v53 = vpop.f32.mrb[27].mxu0  ;;  %v778_v33 = vadd.f32 1.0, %v1373_v12  ;;  %v1977_v49 = vmul.f32 0.5, %v506_v2  ;;  %v707_v22 = vmul.f32 0.70710677, %v1950_v45  ;;  %v776_v10 = vadd.f32 1.0, %v1375_v59 }
 0x190   : > { %v875_v63 = vpack.c.bf16 %v845_v43, %v1922_v7  ;;  %v779_v4 = vadd.f32 1.0, %v1377_v25  ;;  %1390 = verf.f32 %v685_v15  ;;  %v705_v0 = vmul.f32 0.70710677, %v589_v21 }
 0x191   : > { %v1379_v42 = vpop.eup %1378  ;;  %1392 = verf.f32 %v707_v22  ;;  %v530_v38 = vadd.f32 %v1199_v58, %v1793_v18  ;;  %v522_v39 = vadd.f32 %v1793_v18, %v521_v41  ;;  %v639_v56 = vmul.f32 0.5, %v517_v9 }
 0x192   : > { %v777_v6 = vadd.f32 1.0, %v1379_v42  ;;  %1226 = vmatpush3.bf16.xpose.msra.mxu0 %v875_v63  ;;  %1394 = verf.f32 %v705_v0  ;;  %v533_v7 = vadd.f32 %v1200_v54, %v1793_v18  ;;  %v1984_v2 = vadd.f32 %v1793_v18, %v524_v53 }
 0x193   : > { %1227 = vmatprep.subr.bf16.mxu0 %v1554_v16  ;;  %v1381_v59 = vpop.eup %1380  ;;  %v826_v25 = vmul.f32 %v778_v33, %v1932_v1  ;;  %v656_v42 = vmul.f32 0.5, %v586_v24  ;;  %v1988_v22 = vmul.f32 0.5, %v509_v23  ;;  %v690_v58 = vmul.f32 0.70710677, %v530_v38 }
 0x194   : > { %v1203_v12 = vpop.f32.mrb[28].mxu0  ;;  %v1383_v41 = vpop.eup %1382  ;;  %v824_v9 = vmul.f32 %v776_v10, %v1934_v47  ;;  %v825_v63 = vmul.f32 %v777_v6, %v633_v31  ;;  %v688_v15 = vmul.f32 0.70710677, %v522_v39  ;;  %v1993_v54 = vadd.f32 %v1860_v62, %v1793_v18 }
 0x195   : > { %v537_v43 = vpop.f32.mrb[29].mxu0  ;;  %v827_v0 = vmul.f32 %v779_v4, %v1946_v11  ;;  %v659_v50 = vmul.f32 0.5, %v1950_v45  ;;  %1396 = verf.f32 %v690_v58  ;;  %v691_v1 = vmul.f32 0.70710677, %v533_v7  ;;  %v1385_v23 = vpop.eup %1384 }
 0x196   : > { %v1204_v53 = vpop.f32.mrb[30].mxu0  ;;  %v802_v33 = vadd.f32 1.0, %v1381_v59  ;;  %v657_v14 = vmul.f32 0.5, %v589_v21  ;;  %1398 = verf.f32 %v688_v15  ;;  %v689_v47 = vmul.f32 0.70710677, %v1984_v2 }
 0x197   : > { %v540_v24 = vpop.f32.mrb[31].mxu0  ;;  %v1387_v31 = vpop.eup %1386  ;;  %v782_v10 = vadd.f32 1.0, %v1383_v41  ;;  %v642_v6 = vmul.f32 0.5, %v530_v38  ;;  %v640_v44 = vmul.f32 0.5, %v522_v39  ;;  %1400 = verf.f32 %v691_v1 }
 0x198   : > { %v1389_v62 = vpop.eup %1388  ;;  %v783_v48 = vadd.f32 1.0, %v1385_v23  ;;  %1402 = verf.f32 %v689_v47  ;;  %v710_v11 = vmul.f32 0.70710677, %v1993_v54  ;;  %v865_v45 = vpack.c.bf16 %v825_v63, %v824_v9 }
 0x199   : > { %v800_v4 = vadd.f32 1.0, %v1387_v31  ;;  %v2001_v58 = vadd.f32 %v1793_v18, %v1864_v5  ;;  %v2008_v21 = vadd.f32 %v1869_v19, %v1793_v18  ;;  %v866_v38 = vpack.c.bf16 %v827_v0, %v826_v25 }
 0x19a   : > { %1228 = vmatpush3.bf16.xpose.msra.mxu0 %v876_v3  ;;  %v1391_v39 = vpop.eup %1390  ;;  %v643_v59 = vmul.f32 0.5, %v533_v7  ;;  %1404 = verf.f32 %v710_v11  ;;  %1130 = vmatprep.subr.bf16.mxu1 %v865_v45  ;;  %v2012_v41 = vadd.f32 %v1793_v18, %v1876_v26  ;;  %v2015_v5 = vadd.f32 %v1203_v12, %v1793_v18 }
 0x19b   : > { %1229 = vmatprep.subr.bf16.mxu0 %v1554_v16  ;;  %v1393_v8 = vpop.eup %1392  ;;  %v2019_v20 = vmul.f32 %v782_v10, %v1971_v57  ;;  %v780_v19 = vadd.f32 1.0, %v1389_v62  ;;  %v2022_v3 = vmul.f32 %v802_v33, %v1974_v60  ;;  %v708_v7 = vmul.f32 0.70710677, %v2001_v58 }
 0x19c   : > { %v2152_v25 = vpack.c.bf16 %v1848_v40, %v1843_v35  ;;  %v1395_v26 = vpop.eup %1394  ;;  %v781_v9 = vadd.f32 1.0, %v1391_v39  ;;  %v803_v12 = vadd.f32 1.0, %v1393_v8  ;;  %v711_v63 = vmul.f32 0.70710677, %v2008_v21 }
 0x19d   : > { %v709_v15 = vmul.f32 0.70710677, %v2012_v41  ;;  %v2030_v57 = vmul.f32 %v783_v48, %v639_v56  ;;  %v848_v0 = vmul.f32 %v800_v4, %v656_v42  ;;  %v801_v1 = vadd.f32 1.0, %v1395_v26 }
 0x19e   : > { %1131 = vmatpush3.bf16.xpose.msra.mxu1 %v2152_v25  ;;  %1406 = verf.f32 %v708_v7  ;;  %v851_v60 = vmul.f32 %v803_v12, %v659_v50  ;;  %v694_v23 = vmul.f32 0.70710677, %v2015_v5  ;;  %v538_v35 = vadd.f32 %v1793_v18, %v537_v43 }
 0x19f   : > { %1132 = vmatprep.subr.bf16.mxu1 %v866_v38  ;;  %1408 = verf.f32 %v711_v63  ;;  %v1397_v40 = vpop.eup %1396  ;;  %v849_v33 = vmul.f32 %v801_v1, %v657_v14  ;;  %v549_v47 = vadd.f32 %v1204_v53, %v1793_v18  ;;  %v541_v31 = vadd.f32 %v1793_v18, %v540_v24 }
 0x1a0   : > { %1410 = verf.f32 %v709_v15  ;;  %v1399_v10 = vpop.eup %1398  ;;  %v829_v48 = vmul.f32 %v781_v9, %v1988_v22  ;;  %v878_v56 = vpack.c.bf16 %v851_v60, %v2022_v3  ;;  %v786_v42 = vadd.f32 1.0, %v1397_v40 }
 0x1a1   : > { %1412 = verf.f32 %v694_v23  ;;  %v1401_v50 = vpop.eup %1400  ;;  %v877_v62 = vpack.c.bf16 %v849_v33, %v848_v0  ;;  %v784_v11 = vadd.f32 1.0, %v1399_v10  ;;  %v641_v45 = vmul.f32 0.5, %v1984_v2 }
 0x1a2   : > { %v692_v43 = vmul.f32 0.70710677, %v538_v35  ;;  %v1403_v4 = vpop.eup %1402  ;;  %v828_v14 = vmul.f32 %v780_v19, %v1977_v49  ;;  %v2040_v38 = vmul.f32 %v786_v42, %v642_v6  ;;  %v787_v53 = vadd.f32 1.0, %v1401_v50 }
 0x1a3   : > { %v695_v18 = vmul.f32 0.70710677, %v549_v47  ;;  %v832_v24 = vmul.f32 %v784_v11, %v640_v44  ;;  %v785_v39 = vadd.f32 1.0, %v1403_v4  ;;  %v2153_v22 = vpack.c.bf16 %v1845_v36, %v1838_v29  ;;  %1230 = vmatpush3.bf16.xpose.msra.mxu0 %v877_v62 }
 0x1a4   : > { %1414 = verf.f32 %v692_v43  ;;  %v693_v8 = vmul.f32 0.70710677, %v541_v31  ;;  %v1405_v3 = vpop.eup %1404  ;;  %v835_v7 = vmul.f32 %v787_v53, %v643_v59  ;;  %v867_v2 = vpack.c.bf16 %v829_v48, %v828_v14  ;;  %1231 = vmatprep.subr.bf16.mxu0 %v1554_v16 }
 0x1a5   : > { %1416 = verf.f32 %v695_v18  ;;  %v868_v49 = vpack.c.bf16 %v2030_v57, %v2019_v20  ;;  %v833_v6 = vmul.f32 %v785_v39, %v641_v45  ;;  %v662_v44 = vmul.f32 0.5, %v1993_v54 }
 0x1a6   : > { %1133 = vmatpush3.bf16.xpose.msra.mxu1 %v2153_v22  ;;  %v806_v19 = vadd.f32 1.0, %v1405_v3  ;;  %1418 = verf.f32 %v693_v8  ;;  %v660_v25 = vmul.f32 0.5, %v2001_v58  ;;  %v870_v29 = vpack.c.bf16 %v835_v7, %v2040_v38 }
 0x1a7   : > { %1134 = vmatprep.subr.bf16.mxu1 %v867_v2  ;;  %v663_v59 = vmul.f32 0.5, %v2008_v21  ;;  %v869_v26 = vpack.c.bf16 %v833_v6, %v832_v24  ;;  %v661_v63 = vmul.f32 0.5, %v2012_v41  ;;  %v646_v58 = vmul.f32 0.5, %v2015_v5 }
 0x1a8   : > { %v1407_v36 = vpop.eup %1406  ;;  %v854_v20 = vmul.f32 %v806_v19, %v662_v44  ;;  %v2154_v40 = vpack.c.bf16 %v1886_v37, %v1884_v34  ;;  %v644_v33 = vmul.f32 0.5, %v538_v35  ;;  %v647_v48 = vmul.f32 0.5, %v549_v47 }
 0x1a9   : > { %v1409_v9 = vpop.eup %1408  ;;  %v804_v12 = vadd.f32 1.0, %v1407_v36  ;;  %v645_v11 = vmul.f32 0.5, %v541_v31  ;;  %v2155_v35 = vpack.c.bf16 %v1881_v30, %v1879_v28  ;;  %v2156_v31 = vpack.c.bf16 %v1930_v13, %v1924_v51 }
 0x1aa   : > { %v1411_v15 = vpop.eup %1410  ;;  %v807_v57 = vadd.f32 1.0, %v1409_v9  ;;  %v2157_v38 = vpack.c.bf16 %v1912_v32, %v1909_v55  ;;  %v2158_v28 = vpack.c.bf16 %v1961_v27, %v1952_v46 }
 0x1ab   : > { %v1413_v0 = vpop.eup %1412  ;;  %v852_v54 = vmul.f32 %v804_v12, %v660_v25  ;;  %v805_v1 = vadd.f32 1.0, %v1411_v15  ;;  %1232 = vmatpush3.bf16.xpose.msra.mxu0 %v878_v56 }
 0x1ac   : > { %v855_v60 = vmul.f32 %v807_v57, %v663_v59  ;;  %v790_v23 = vadd.f32 1.0, %v1413_v0  ;;  %1233 = vmatprep.subr.bf16.mxu0 %v1554_v16 }
 0x1ad   : > { %v853_v21 = vmul.f32 %v805_v1, %v661_v63 }
 0x1ae   : > { %1135 = vmatpush3.bf16.xpose.msra.mxu1 %v2154_v40  ;;  %v1415_v41 = vpop.eup %1414  ;;  %v880_v10 = vpack.c.bf16 %v855_v60, %v854_v20  ;;  %v838_v5 = vmul.f32 %v790_v23, %v646_v58 }
 0x1af   : > { %1136 = vmatprep.subr.bf16.mxu1 %v868_v49  ;;  %v1417_v42 = vpop.eup %1416  ;;  %v879_v50 = vpack.c.bf16 %v853_v21, %v852_v54  ;;  %v788_v62 = vadd.f32 1.0, %v1415_v41 }
 0x1b0   : > { %v1419_v45 = vpop.eup %1418  ;;  %v791_v43 = vadd.f32 1.0, %v1417_v42 }
 0x1b1   : > { %v836_v4 = vmul.f32 %v788_v62, %v644_v33  ;;  %v789_v14 = vadd.f32 1.0, %v1419_v45 }
 0x1b2   : > { %v839_v34 = vmul.f32 %v791_v43, %v647_v48 }
 0x1b3   : > { %v837_v37 = vmul.f32 %v789_v14, %v645_v11  ;;  %1234 = vmatpush3.bf16.xpose.msra.mxu0 %v879_v50 }
 0x1b4   : > { %v872_v56 = vpack.c.bf16 %v839_v34, %v838_v5  ;;  %1235 = vmatprep.subr.bf16.mxu0 %v1554_v16  ;;  %v2159_v16 = vpack.c.bf16 %v1954_v52, %v1944_v61 }
 0x1b5   : > { %v871_v47 = vpack.c.bf16 %v837_v37, %v836_v4 }
 0x1b6   : > { %1137 = vmatpush3.bf16.xpose.msra.mxu1 %v2155_v35 }
 0x1b7   : > { %1138 = vmatprep.subr.bf16.mxu1 %v869_v26 }
 0x1bb   : > { %1236 = vmatpush3.bf16.xpose.msra.mxu0 %v880_v10 }
 0x1be   : > { %1139 = vmatpush3.bf16.xpose.msra.mxu1 %v2156_v31 }
 0x1bf   : > { %1140 = vmatprep.subr.bf16.mxu1 %v870_v29 }
 0x1c2   : > { %1238 = vmatmul.mubr.bf16.vlgmr.msra.gmra.mrb[32].mxu0 %v1786_v17 }
 0x1c6   : > { %1141 = vmatpush3.bf16.xpose.msra.mxu1 %v2157_v38 }
 0x1c7   : > { %1142 = vmatprep.subr.bf16.mxu1 %v871_v47 }
 0x1ce   : > { %1143 = vmatpush3.bf16.xpose.msra.mxu1 %v2158_v28 }
 0x1cf   : > { %1144 = vmatprep.subr.bf16.mxu1 %v872_v56 }
 0x1d6   : > { %1145 = vmatpush3.bf16.xpose.msra.mxu1 %v2159_v16 }
 0x1dd   : > { %1147 = vmatmul.mubr.bf16.vlgmr.msra.gmra.mrb[16].mxu1 %v1786_v17 }
 0x295   : > { %v956_v30 = vpop.f32.mrb[32].mxu0 }
 0x296   : > { %967 = vst [vmem:[%s236_s22 + $0x8] sm:$0xf] %v956_v30  ;;  %v1239_v51 = vpop.f32.mrb[33].mxu0 }
 0x297   : > { %v959_v55 = vpop.f32.mrb[34].mxu0 }
 0x298   : > { %v1240_v32 = vpop.f32.mrb[35].mxu0 }
 0x2ae   : > { %975 = sbr.rel (!%p2160_p9) target bundleno = 720 (0x2d0), region = 48 }
 0x2b0   : > { %v915_v13 = vpop.f32.mrb[16].mxu1 }
 0x2b1   : > { %v917_v53 = vpop.f32.mrb[17].mxu1 }
 0x2b2   : > { %v964_v18 = vcombine.low %v915_v13, %v917_v53  ;;  %v919_v46 = vpop.f32.mrb[18].mxu1 }
 0x2b3   : > { %v920_v27 = vpop.f32.mrb[19].mxu1 }
 0x2b4   : > { %966 = vst [vmem:[%s236_s22] sm:$0xff] %v964_v18 }
 0x2b5   : > { %s2169_s12 = smov (!%p978_p10, %s977_s12), 3 }
 0x2b6   : > { %s2081_s25 = sshll.u32 %s2169_s12, 6 }
 0x2b7   : > { %s982_s14 = ssub.s32 192, %s2081_s25 }
 0x2b8   : > { %983 = vsyncadd %s969_s10, %s982_s14  ;;  %p1090_p1 = scmp.ne.s32.totalorder %s2081_s25, 0  ;;  %s1097_s20 = smul.u32 192, %s1603_s19 }
 0x2b9   : > { %s989_s27 = sshll.u32 %s236_s22, 4  ;;  %s1556_s26 = smov [#allocation7]   ;;  %s990_s27 = int_to_ptr.vmem [resolvable:$true] %s989_s27 }
 0x2ba   : > { %s2091_s8 = scalar_lea.hbm %s2137_s4, %s1097_s20  ;;  %s1476_s9 = scalar_lea.vmem %s990_s27, %s2081_s25 }
 0x2bb   : > { %p1477_p4 = scmp.ne.s32.totalorder %s990_s27, %s1476_s9  ;;  %s1480_s29 = sshll.u32 %s1556_s26, 4  ;;  %s1481_s29 = int_to_ptr.vmem [resolvable:$false] %s1480_s29 }
 0x2bc   : > { %s1482_s6 = scalar_lea.vmem %s1481_s29, 384  ;;  %p1483_p12 = scmp.lt.s32.totalorder %s990_s27, %s1481_s29 }
 0x2bd   : > { %p1478_p5 = pnand %p1477_p4, %p1090_p1  ;;  %p1484_p2 = scmp.lt.s32.totalorder %s1482_s6, %s1476_s9 }
 0x2bf   : > { %p1479_p11 = pneg %p1478_p5  ;;  %p1485_p3 = por %p1484_p2, %p1483_p12 }
 0x2c1   : > { %p1486_p13 = pnand %p1485_p3, %p1479_p11 }
 0x2c3   : > { %1489 = shalt.err (!%p1486_p13)
}
 0x2c4   : > { %s1490_s19 = scalar_lea.hbm %s2091_s8, %s2081_s25  ;;  %s1494_s22 = scalar_lea.hbm %s2137_s4, 320 }
 0x2c5   : > { %p1491_p7 = scmp.ne.s32.totalorder %s2091_s8, %s1490_s19  ;;  %p1495_p9 = scmp.lt.u32.totalorder %s2091_s8, %s2137_s4 }
 0x2c6   : > { %p1496_p10 = scmp.lt.u32.totalorder %s1494_s22, %s1490_s19  ;;  %p1498_p5 = scmp.lt.u32.totalorder %s1490_s19, %s2091_s8 }
 0x2c7   : > { %p1492_p6 = pnand %p1491_p7, %p1090_p1 }
 0x2c8   : > { %p1497_p4 = por %p1496_p10, %p1495_p9 }
 0x2c9   : > { %p1493_p8 = pneg %p1492_p6 }
 0x2ca   : > { %p1499_p11 = por %p1498_p5, %p1497_p4 }
 0x2cc   : > { %p1500_p12 = pnand %p1499_p11, %p1493_p8 }
 0x2ce   : > { %1503 = shalt.err (!%p1500_p12)
}
 0x2cf   : > { %992 = dma.vmem_to_hbm [thread:$0]  (%p1090_p1), %s990_s27, %s2081_s25, %s2091_s8, %s969_s10  }
 0x2d0 PF: > { %s1001_s14 = sand.u32 1, %s1534_s15   ;;  %p2161_p2 = scmp.ne.s32.totalorder %s2144_s28, 0 }
 0x2d1   : > { %s1002_s20 = scalar_lea.sflag [#allocation4], %s1001_s14 }
 0x2d2   : > { %p1271_p3 = pnand %p1072_p0, %p2161_p2 }
 0x2d4   : > { %1529 = dma.done.wait (!%p1271_p3), %s1002_s20, 192  }
 0x2d5   : > { %1531 = vsyncadd (!%p1271_p3), %s1002_s20, 4294967104  ;;  %p18_p13 = scmp.ge.s32.totalorder %s1607_s21, 4   ;;  %s2162_s15 = smov %s1538_s16 }
 0x2d6   : > { %s2163_s16 = smov %s1542_s17  ;;  %s2164_s17 = smov %s1619_s24 }
 0x2d7   : > { %s2165_s18 = smov %s1607_s21  ;;  %20 = sbr.rel (!%p18_p13) target bundleno = 6 (0x6), region = 85 }
 0x2de   :  { %1007 = vsyncpa [#allocation3], 1 }
 0x2df   :  { %1009 = vsyncpa [#allocation3 + $0x1], 1 }
 0x2e0   :  { %1010 = vsyncpa [#allocation6], 1 }
 0x2e1   :  { %1011 = vsyncpa [#allocation4], 1 }
 0x2e2   :  { %1013 = vsyncpa [#allocation4 + $0x1], 1 }

</bundles_post_ra>
